<compile_context>
chip_gen: v7x
topology: tpu7x:2x2x1
jax: 0.10.0
libtpu: 0.0.40
codegen_flags: <defaults>
</compile_context>

<pallas_src>
import functools

import jax
import jax.numpy as jnp
from jax import lax
from jax.experimental import pallas as pl
from jax.experimental.pallas import tpu as pltpu


def _round_up(x, m):
    return ((x + m - 1) // m) * m


def attention_kernel(q_ref, enc_ref, maskb_ref, ctx_ref, attn_ref):
    """One batch block.

    q_ref    : (TB, Hp)     f32     folded query rows (dec @ W_eff + b_q)
    enc_ref  : (TB, Sp, Hp) stream  encoder outputs (f32 or bf16)
    maskb_ref: (TB, Sp)     f32     additive mask bias (0 / -1e7 / -2e7 pad)
    ctx_ref  : (TB, Hp)     f32     context output
    attn_ref : (TB, Sp)     f32     attention distribution output
    """
    enc = enc_ref[...]                                    # streamed dtype, no f32 copy
    q = q_ref[...].astype(enc.dtype)[:, None, :]          # (TB, 1, Hp)

    # energy[b,s] = sum_h q[b,h] * enc[b,s,h]  — batched MXU matmul, f32 accum.
    energy = lax.dot_general(
        q, enc, (((2,), (2,)), ((0,), (0,))),
        preferred_element_type=jnp.float32)[:, 0, :]      # (TB, Sp)
    energy = energy + maskb_ref[...]

    # Softmax over the sequence axis (f32, exact division -> rows sum to 1).
    # NOTE: a fully-masked real row gives softmax over the masked-but-real
    # positions (pads pushed to -2e7) instead of torch's uniform-over-all-S;
    # both are degenerate, and unmasked weights are identical.
    e_max = jnp.max(energy, axis=-1, keepdims=True)
    p = jnp.exp(energy - e_max)
    attn = p / jnp.sum(p, axis=-1, keepdims=True)

    # ctx[b,h] = sum_s attn[b,s] * enc[b,s,h]  — batched MXU matmul, f32 accum.
    ctx = lax.dot_general(
        attn.astype(enc.dtype)[:, None, :], enc, (((2,), (1,)), ((0,), (0,))),
        preferred_element_type=jnp.float32)[:, 0, :]      # (TB, Hp)

    ctx_ref[...] = ctx
    attn_ref[...] = attn


@functools.partial(jax.jit, static_argnames=("stream_dtype",))
def attention_forward(decoder_hidden, encoder_outputs, encoder_masks,
                      w_dec, b_dec, w_enc, b_enc, *, stream_dtype=None):
    """Pallas forward of `Attention`.

    decoder_hidden : (B, H) f32; encoder_outputs : (B, S, H) f32
    encoder_masks  : (B, S) int (1 keep, 0 masked)
    w_dec / w_enc  : (H, H) PyTorch-convention (out, in) Linear weights
    b_dec / b_enc  : (H,)
    stream_dtype   : dtype used to stream encoder_outputs (None -> input dtype;
                     jnp.bfloat16 halves HBM traffic, accum/softmax stay f32).
    Returns (context_vecs (B, H), attn_dists (B, S)), both f32.
    """
    f32 = jnp.float32
    B, S, H = encoder_outputs.shape
    if stream_dtype is None:
        stream_dtype = encoder_outputs.dtype

    # ---- Fold encoder_proj into the query; hoisted to one XLA matmul over B ----
    w_eff = w_dec.astype(f32).T @ w_enc.astype(f32)       # (H, H)
    b_q = b_dec.astype(f32) @ w_enc.astype(f32)           # (H,)
    q = decoder_hidden.astype(f32) @ w_eff + b_q          # (B, H)
    # (query . b_enc is constant over s -> dropped, softmax shift invariance.)

    # ---- Padded, lane/sublane-aligned shapes ----
    Hp = _round_up(H, 128)
    Sp = _round_up(S, 128) if S >= 128 else _round_up(S, 8)
    # TODO(synk): at H << 128 the lane padding streams up to 4x the real enc
    # bytes; production layouts should keep H a multiple of 128 (or fold S*H).

    # ---- Per-generation block budget ----
    try:
        vmem_cap = pltpu.get_tpu_info().vmem_capacity_bytes
    except Exception:  # pragma: no cover - conservative fallback
        vmem_cap = 64 * 1024 * 1024
    if vmem_cap >= 96 * 1024 * 1024:          # v5e / v6e: 128 MiB physical VMEM
        block_cap = 8 * 1024 * 1024
        vmem_limit = 100 * 1024 * 1024
    else:                                     # v7x: 64 MiB per TensorCore
        block_cap = 4 * 1024 * 1024
        vmem_limit = 48 * 1024 * 1024

    row_bytes = Sp * Hp * jnp.dtype(stream_dtype).itemsize   # one batch row of enc
    tb_cap = max(8, min(1024, (block_cap // max(row_bytes, 1)) // 8 * 8))
    Bp8 = _round_up(B, 8)
    n_blocks = max(1, -(-Bp8 // tb_cap))
    if Bp8 >= 16:
        n_blocks = max(n_blocks, 2)           # keep both v7x TensorCores busy
    tb = _round_up(-(-Bp8 // n_blocks), 8)    # near-divisor of B -> minimal padding
    Bp = tb * n_blocks

    # Guard the tb=8 floor: one double-buffered enc block must fit the budget.
    if 2 * tb * row_bytes > int(0.75 * vmem_limit):
        # TODO(synk): add an S grid axis ("arbitrary") with online-softmax for
        # very long sequences instead of failing here.
        raise ValueError(
            f"encoder block ({tb}x{Sp}x{Hp}, x2 buffers = {2 * tb * row_bytes} B) "
            f"exceeds the VMEM budget ({vmem_limit} B); S-blocking required.")

    def pad_to(x, shape, value=0):
        return jnp.pad(x, [(0, t - s) for s, t in zip(x.shape, shape)],
                       constant_values=value)

    # TODO(synk): in a decoder loop, pad/cast encoder_outputs once per sequence
    # (or emit bf16 / padded layout from the encoder), not once per decode step.
    q_p = pad_to(q, (Bp, Hp))
    enc_p = pad_to(encoder_outputs, (Bp, Sp, Hp)).astype(stream_dtype)
    # Additive mask bias: 0 keep, -1e7 masked, -2e7 for padded positions.
    maskb = jnp.where(encoder_masks > 0, 0.0, -1e7).astype(f32)
    maskb_p = pad_to(maskb, (Bp, Sp), value=-2e7)

    itemsize = jnp.dtype(stream_dtype).itemsize
    cost = pl.CostEstimate(
        flops=4 * Bp * Sp * Hp,                          # two contractions
        transcendentals=Bp * Sp,                         # exp
        bytes_accessed=(Bp * Sp * Hp * itemsize          # enc stream (dominant)
                        + Bp * Hp * 4 + Bp * Sp * 4      # q + mask in
                        + Bp * Hp * 4 + Bp * Sp * 4))    # ctx + attn out

    grid_spec = pltpu.PrefetchScalarGridSpec(
        num_scalar_prefetch=0,
        grid=(n_blocks,),
        in_specs=[
            pl.BlockSpec((tb, Hp), lambda i: (i, 0)),         # folded query
            pl.BlockSpec((tb, Sp, Hp), lambda i: (i, 0, 0)),  # encoder outputs
            pl.BlockSpec((tb, Sp), lambda i: (i, 0)),         # additive mask bias
        ],
        out_specs=[
            pl.BlockSpec((tb, Hp), lambda i: (i, 0)),         # context
            pl.BlockSpec((tb, Sp), lambda i: (i, 0)),         # attention dist
        ],
    )

    ctx_p, attn_p = pl.pallas_call(
        attention_kernel,
        out_shape=(jax.ShapeDtypeStruct((Bp, Hp), f32),
                   jax.ShapeDtypeStruct((Bp, Sp), f32)),
        grid_spec=grid_spec,
        compiler_params=pltpu.CompilerParams(
            dimension_semantics=("parallel",),   # megacore: shard batch blocks
            vmem_limit_bytes=vmem_limit),
        cost_estimate=cost,
    )(q_p, enc_p, maskb_p)

    return ctx_p[:B, :H], attn_p[:B, :S]


# ----------------------------- references ---------------------------------- #

def _xavier_uniform(key, shape):
    fan_out, fan_in = shape
    limit = (6.0 / (fan_in + fan_out)) ** 0.5
    return jax.random.uniform(key, shape, jnp.float32, -limit, limit)


def _reference(decoder_hidden, encoder_outputs, encoder_masks,
               w_dec, b_dec, w_enc, b_enc):
    """Exact JAX replica of the PyTorch forward."""
    query = decoder_hidden @ w_dec.T + b_dec                     # (B, H)
    key = encoder_outputs @ w_enc.T + b_enc                      # (B, S, H)
    energy = jnp.sum(key * query[:, None, :], axis=-1)           # (B, S)
    energy = jnp.where(encoder_masks > 0, energy, -1e7)
    attn = jax.nn.softmax(energy, axis=-1)
    ctx = jnp.sum(encoder_outputs * attn[:, :, None], axis=1)    # (B, H)
    return ctx, attn


def _reference_folded(decoder_hidden, encoder_outputs, encoder_masks,
                      w_dec, b_dec, w_enc, b_enc, *, stream_dtype):
    """Mirrors the kernel's folded / quantized math (for the bf16-stream check);
    remaining deltas vs the kernel are only accumulation order."""
    f32 = jnp.float32
    w_eff = w_dec.T @ w_enc
    b_q = b_dec @ w_enc
    q = decoder_hidden @ w_eff + b_q                             # f32, as wrapper
    q_q = q.astype(stream_dtype).astype(f32)
    enc_q = encoder_outputs.astype(stream_dtype).astype(f32)
    energy = jnp.sum(enc_q * q_q[:, None, :], axis=-1)
    energy = energy + jnp.where(encoder_masks > 0, 0.0, -1e7)
    attn = jax.nn.softmax(energy, axis=-1)
    attn_q = attn.astype(stream_dtype).astype(f32)
    ctx = jnp.sum(enc_q * attn_q[:, :, None], axis=1)
    return ctx, attn


if __name__ == "__main__":
    B, S, H = 2, 8, 32
    key0 = jax.random.PRNGKey(0)
    k_dh, k_eo, k_wd, k_we, k_bd, k_be = jax.random.split(key0, 6)

    decoder_hidden = jax.random.normal(k_dh, (B, H), jnp.float32)
    encoder_outputs = jax.random.normal(k_eo, (B, S, H), jnp.float32)
    # mask: last two positions of every sequence are masked out
    encoder_masks = jnp.concatenate(
        [jnp.ones((B, S - 2), jnp.int32), jnp.zeros((B, 2), jnp.int32)], axis=1)

    # PyTorch-style init: xavier_uniform_ weights, default-uniform biases.
    w_dec = _xavier_uniform(k_wd, (H, H))
    w_enc = _xavier_uniform(k_we, (H, H))
    b_lim = 1.0 / (H ** 0.5)
    b_dec = jax.random.uniform(k_bd, (H,), jnp.float32, -b_lim, b_lim)
    b_enc = jax.random.uniform(k_be, (H,), jnp.float32, -b_lim, b_lim)

    args = (decoder_hidden, encoder_outputs, encoder_masks,
            w_dec, b_dec, w_enc, b_enc)

    # ---- f32 streaming path: exact module semantics ----
    ctx, attn = attention_forward(*args)
    jax.block_until_ready((ctx, attn))
    ctx_ref, attn_ref = _reference(*args)
    assert ctx.shape == (B, H) and attn.shape == (B, S)
    assert jnp.allclose(ctx, ctx_ref, atol=1e-2, rtol=1e-2), "ctx mismatch (f32)"
    assert jnp.allclose(attn, attn_ref, atol=1e-2, rtol=1e-2), "attn mismatch (f32)"
    # Exact softmax division -> rows sum to 1 tightly.
    assert jnp.allclose(jnp.sum(attn, axis=-1), 1.0, atol=1e-4)

    # ---- bf16 streaming path ----
    ctx_bf, attn_bf = attention_forward(*args, stream_dtype=jnp.bfloat16)
    jax.block_until_ready((ctx_bf, attn_bf))
    # Tight check against an identically-quantized folded reference.
    ctx_q, attn_q = _reference_folded(*args, stream_dtype=jnp.bfloat16)
    assert jnp.allclose(ctx_bf, ctx_q, atol=1e-2, rtol=1e-2), "ctx mismatch (bf16)"
    assert jnp.allclose(attn_bf, attn_q, atol=1e-2, rtol=1e-2), "attn mismatch (bf16)"
    # Looser check against the true f32 module (documents the accepted bf16 error).
    assert jnp.allclose(ctx_bf, ctx_ref, atol=1e-1, rtol=1e-1), "ctx drift (bf16 vs f32)"
    assert jnp.allclose(attn_bf, attn_ref, atol=1e-1, rtol=1e-1), "attn drift (bf16 vs f32)"

    print("KERNEL_OK")
</pallas_src>

<mosaic_0001>
module attributes {stable_mosaic.version = 11 : i64} {
  func.func @attention_kernel(%arg0: i32, %arg1: memref<8x128xf32, #tpu.memory_space<vmem>>, %arg2: memref<8x8x128xf32, #tpu.memory_space<vmem>>, %arg3: memref<8x8xf32, #tpu.memory_space<vmem>>, %arg4: memref<8x128xf32, #tpu.memory_space<vmem>>, %arg5: memref<8x8xf32, #tpu.memory_space<vmem>>) attributes {dimension_semantics = [#tpu.dimension_semantics<parallel>], iteration_bounds = array<i64: 1>, scalar_prefetch = 0 : i64, scratch_operands = 0 : i64, tpu.core_type = #tpu.core_type<tc>, window_params = [{transform_indices = @transform_0, window_bounds = array<i64: 8, 128>}, {transform_indices = @transform_1, window_bounds = array<i64: 8, 8, 128>}, {transform_indices = @transform_2, window_bounds = array<i64: 8, 8>}, {transform_indices = @transform_3, window_bounds = array<i64: 8, 128>}, {transform_indices = @transform_4, window_bounds = array<i64: 8, 8>}]} {
    %c0 = arith.constant 0 : index
    %c0_0 = arith.constant 0 : index
    %c0_1 = arith.constant 0 : index
    %0 = vector.load %arg2[%c0, %c0_0, %c0_1] : memref<8x8x128xf32, #tpu.memory_space<vmem>>, vector<8x8x128xf32>
    %c0_2 = arith.constant 0 : index
    %c0_3 = arith.constant 0 : index
    %1 = vector.load %arg1[%c0_2, %c0_3] : memref<8x128xf32, #tpu.memory_space<vmem>>, vector<8x128xf32>
    %2 = vector.shape_cast %1 : vector<8x128xf32> to vector<8x1x128xf32>
    %cst = arith.constant dense<0.000000e+00> : vector<8x1x8xf32>
    %3 = tpu.matmul %2, %0, %cst {dimension_numbers = #tpu.dot_dimension_numbers<[2], [2], [1], [1], [0, 0, 0, 1, 1, 1], [0], [0]>} : vector<8x1x128xf32>, vector<8x8x128xf32>, vector<8x1x8xf32> -> vector<8x1x8xf32>
    %4 = vector.shape_cast %3 : vector<8x1x8xf32> to vector<8x8xf32>
    %c0_4 = arith.constant 0 : index
    %c0_5 = arith.constant 0 : index
    %5 = vector.load %arg3[%c0_4, %c0_5] : memref<8x8xf32, #tpu.memory_space<vmem>>, vector<8x8xf32>
    %6 = arith.addf %4, %5 : vector<8x8xf32>
    %cst_6 = arith.constant dense<0xFF800000> : vector<8xf32>
    %7 = vector.multi_reduction <maximumf>, %6, %cst_6 [1] : vector<8x8xf32> to vector<8xf32>
    %8 = vector.shape_cast %7 : vector<8xf32> to vector<8x1xf32>
    %9 = vector.broadcast %8 : vector<8x1xf32> to vector<8x8xf32>
    %10 = arith.subf %6, %9 : vector<8x8xf32>
    %11 = math.exp %10 : vector<8x8xf32>
    %cst_7 = arith.constant dense<0.000000e+00> : vector<8xf32>
    %12 = vector.multi_reduction <add>, %11, %cst_7 [1] : vector<8x8xf32> to vector<8xf32>
    %13 = vector.shape_cast %12 : vector<8xf32> to vector<8x1xf32>
    %14 = vector.broadcast %13 : vector<8x1xf32> to vector<8x8xf32>
    %15 = arith.divf %11, %14 : vector<8x8xf32>
    %16 = vector.shape_cast %15 : vector<8x8xf32> to vector<8x1x8xf32>
    %cst_8 = arith.constant dense<0.000000e+00> : vector<8x1x128xf32>
    %17 = tpu.matmul %16, %0, %cst_8 {dimension_numbers = #tpu.dot_dimension_numbers<[2], [1], [1], [2], [0, 0, 0, 1, 1, 2], [0], [0]>} : vector<8x1x8xf32>, vector<8x8x128xf32>, vector<8x1x128xf32> -> vector<8x1x128xf32>
    %18 = vector.shape_cast %17 : vector<8x1x128xf32> to vector<8x128xf32>
    %c0_9 = arith.constant 0 : index
    %c0_10 = arith.constant 0 : index
    %19 = vector.load %arg4[%c0_9, %c0_10] : memref<8x128xf32, #tpu.memory_space<vmem>>, vector<8x128xf32>
    tpu.vector_store %arg4[%c0_9, %c0_10], %18 {strides = array<i32>} : memref<8x128xf32, #tpu.memory_space<vmem>>, vector<8x128xf32>,
    %c0_11 = arith.constant 0 : index
    %c0_12 = arith.constant 0 : index
    %20 = vector.load %arg5[%c0_11, %c0_12] : memref<8x8xf32, #tpu.memory_space<vmem>>, vector<8x8xf32>
    tpu.vector_store %arg5[%c0_11, %c0_12], %15 {strides = array<i32>} : memref<8x8xf32, #tpu.memory_space<vmem>>, vector<8x8xf32>,
    return
  }
  func.func @transform_0(%arg0: i32) -> (i32, i32) {
    %c0_i32 = arith.constant 0 : i32
    %c0_i32_0 = arith.constant 0 : i32
    return %arg0, %c0_i32 : i32, i32
  }
  func.func @transform_1(%arg0: i32) -> (i32, i32, i32) {
    %c0_i32 = arith.constant 0 : i32
    %c0_i32_0 = arith.constant 0 : i32
    %c0_i32_1 = arith.constant 0 : i32
    return %arg0, %c0_i32, %c0_i32_0 : i32, i32, i32
  }
  func.func @transform_2(%arg0: i32) -> (i32, i32) {
    %c0_i32 = arith.constant 0 : i32
    %c0_i32_0 = arith.constant 0 : i32
    return %arg0, %c0_i32 : i32, i32
  }
  func.func @transform_3(%arg0: i32) -> (i32, i32) {
    %c0_i32 = arith.constant 0 : i32
    %c0_i32_0 = arith.constant 0 : i32
    return %arg0, %c0_i32 : i32, i32
  }
  func.func @transform_4(%arg0: i32) -> (i32, i32) {
    %c0_i32 = arith.constant 0 : i32
    %c0_i32_0 = arith.constant 0 : i32
    return %arg0, %c0_i32 : i32, i32
  }
}

</mosaic_0001>

<bundles_post_ra>
// kernel: attention_forward.1
= control target key start
LH: loop header
LB: loop body
LE: loop exit
PB: predicated region body
PF: predicated region fallthrough
CT: control target
= control target key end

     0   :  { %v30_v0 = vlaneseq  ;;  %v1588_v1 = vmov 0.0   ;;  %v1589_v4 = vmov 1966171168   ;;  %vm1590_vm0 = vmmov 0   ;;  %s1763_s1 = inlined_call_operand.vmem [shape: f32[8,8,128], index: 1, kind: input, shape index: {}]   ;;  %s1764_s0 = inlined_call_operand.vmem [shape: f32[8,128], index: 0, kind: input, shape index: {}]   ;;  %s1765_s2 = inlined_call_operand.vmem [shape: f32[8,8], index: 2, kind: input, shape index: {}]   ;;  %s1766_s4 = inlined_call_operand.vmem [shape: f32[8,8], index: 4, kind: output, shape index: {1}]   ;;  %s1767_s3 = inlined_call_operand.vmem [shape: f32[8,128], index: 3, kind: output, shape index: {0}]  }
   0x1   :  { %1472 = vmatprep.subr.mxu0 %v1588_v1  ;;  %v16_v2 = vld [vmem:[%s1763_s1] sm:$0xff]  ;;  %1477 = vmatprep.subr.mxu1 %v1588_v1  ;;  %v17_v3 = vld [vmem:[%s1763_s1 + $0x8] sm:$0xff]  ;;  %v28_v5 = vunpack.c.l.s4 %v1589_v4  ;;  %v1636_v13 = vld [vmem:[%s1763_s1 + $0x10] sm:$0xff]  ;;  %vm677_vm1 = vcmask 1041409   ;;  %vm680_vm2 = vcmask 1042434   ;;  %vm683_vm3 = vcmask 1043459  }
   0x2   :  { %1473 = vmatpush3.xpose.msra.mxu0 %v16_v2  ;;  %1478 = vmatpush3.xpose.msra.mxu1 %v17_v3  ;;  %v31_v6 = vshrl.u32 %v30_v0, 7  ;;  %v24_v8 = vld [vmem:[%s1764_s0] sm:$0xff]  ;;  %v1641_v18 = vld [vmem:[%s1763_s1 + $0x18] sm:$0xff]  ;;  %v1659_v22 = vld [vmem:[%s1763_s1 + $0x28] sm:$0xff]  ;;  %vm686_vm4 = vcmask 1044484   ;;  %vm689_vm5 = vcmask 1045509  }
   0x3   :  { %1474 = vmatprep.mubr.msk.f32.mxu0 %vm1590_vm0, %v1588_v1  ;;  %v29_v7 = vunpack.c.0.s8 %v28_v5  ;;  %1482 = vmatprep.subr.mxu0 %v1588_v1  ;;  %v26_v9 = vcombine.high %v24_v8, %v24_v8  ;;  %v1650_v20 = vld [vmem:[%s1763_s1 + $0x20] sm:$0xff]  ;;  %v1668_v24 = vld [vmem:[%s1763_s1 + $0x30] sm:$0xff]  ;;  %v1677_v26 = vld [vmem:[%s1763_s1 + $0x38] sm:$0xff]  ;;  %vm692_vm6 = vcmask 1046534   ;;  %vm695_vm7 = vcmask 1047559  }
   0x4   :  { %1479 = vmatprep.mubr.msk.f32.mxu1 %vm1590_vm0, %v1588_v1  ;;  %1487 = vmatprep.subr.mxu1 %v1588_v1  ;;  %v643_v29 = vld [vmem:[%s1765_s2] sm:$0xff]  ;;  %vm698_vm8 = vcmask 64512  }
   0x5   :  { %v32_v10 = vsub.s32 %v29_v7, %v31_v6  ;;  %v645_v30 = vrot.slane %v643_v29, 1  ;;  %v646_v33 = vrot.slane %v643_v29, 2  ;;  %v647_v37 = vrot.slane %v643_v29, 3 }
   0x6   :  { %v648_v43 = vrot.slane %v643_v29, 4  ;;  %v649_v49 = vrot.slane %v643_v29, 5  ;;  %v650_v55 = vrot.slane %v643_v29, 6  ;;  %v651_v61 = vrot.slane %v643_v29, 7 }
   0x7   :  { %v33_v11 = vrot.slane %v24_v8, %v32_v10  ;;  %v40_v15 = vrot.slane %v26_v9, %v32_v10 }
   0x9   :  { %v49_v12 = vrot.slane %v33_v11, %v32_v10  ;;  %v41_v14 = vcombine.high %v33_v11, %v33_v11  ;;  %v42_v21 = vcombine.high %v40_v15, %v40_v15  ;;  %v56_v23 = vrot.slane %v40_v15, %v32_v10 }
   0xb   :  { %v71_v16 = vcombine.high %v49_v12, %v49_v12  ;;  %1475 = vmatmul.mubr.f32.vlgmr.msra.gmra.mrb[0].mxu0 %v49_v12  ;;  %v63_v17 = vrot.slane %v41_v14, %v32_v10  ;;  %v70_v25 = vrot.slane %v42_v21, %v32_v10  ;;  %v72_v27 = vcombine.high %v56_v23, %v56_v23 }
   0xc   :  { %1483 = vmatpush3.xpose.msra.mxu0 %v1636_v13  ;;  %1484 = vmatprep.mubr.msk.f32.mxu0 %vm1590_vm0, %v1588_v1 }
   0xd   :  { %v73_v19 = vcombine.high %v63_v17, %v63_v17  ;;  %1480 = vmatmul.mubr.f32.vlgmr.msra.gmra.mrb[0].mxu1 %v63_v17  ;;  %1492 = vmatprep.subr.mxu0 %v1588_v1  ;;  %v74_v28 = vcombine.high %v70_v25, %v70_v25 }
   0xe   :  { %1488 = vmatpush3.xpose.msra.mxu1 %v1641_v18  ;;  %1489 = vmatprep.mubr.msk.f32.mxu1 %vm1590_vm0, %v1588_v1 }
   0xf   :  { %1485 = vmatmul.mubr.f32.vlgmr.msra.gmra.mrb[2].mxu0 %v71_v16  ;;  %1497 = vmatprep.subr.mxu1 %v1588_v1 }
  0x10   :  { %1493 = vmatpush3.xpose.msra.mxu0 %v1650_v20  ;;  %1494 = vmatprep.mubr.msk.f32.mxu0 %vm1590_vm0, %v1588_v1 }
  0x11   :  { %1490 = vmatmul.mubr.f32.vlgmr.msra.gmra.mrb[2].mxu1 %v73_v19  ;;  %1502 = vmatprep.subr.mxu0 %v1588_v1 }
  0x12   :  { %1498 = vmatpush3.xpose.msra.mxu1 %v1659_v22  ;;  %1499 = vmatprep.mubr.msk.f32.mxu1 %vm1590_vm0, %v1588_v1 }
  0x13   :  { %1495 = vmatmul.mubr.f32.vlgmr.msra.gmra.mrb[4].mxu0 %v56_v23  ;;  %1507 = vmatprep.subr.mxu1 %v1588_v1 }
  0x14   :  { %1503 = vmatpush3.xpose.msra.mxu0 %v1668_v24  ;;  %1504 = vmatprep.mubr.msk.f32.mxu0 %vm1590_vm0, %v1588_v1 }
  0x15   :  { %1500 = vmatmul.mubr.f32.vlgmr.msra.gmra.mrb[4].mxu1 %v70_v25  ;;  %1512 = vmatprep.subr.mxu0 %v1588_v1 }
  0x16   :  { %1508 = vmatpush3.xpose.msra.mxu1 %v1677_v26  ;;  %1509 = vmatprep.mubr.msk.f32.mxu1 %vm1590_vm0, %v1588_v1 }
  0x17   :  { %1505 = vmatmul.mubr.f32.vlgmr.msra.gmra.mrb[6].mxu0 %v72_v27  ;;  %1517 = vmatprep.subr.mxu1 %v1588_v1 }
  0x18   :  { %1513 = vmatpush3.msra.mxu0 %v16_v2  ;;  %1514 = vmatprep.mubr.msk.f32.mxu0 %vm1590_vm0, %v1588_v1 }
  0x19   :  { %1510 = vmatmul.mubr.f32.vlgmr.msra.gmra.mrb[6].mxu1 %v74_v28  ;;  %1522 = vmatprep.subr.mxu0 %v1588_v1 }
  0x1a   :  { %1518 = vmatpush3.msra.mxu1 %v17_v3  ;;  %1519 = vmatprep.mubr.msk.f32.mxu1 %vm1590_vm0, %v1588_v1 }
  0x1b   :  { %1527 = vmatprep.subr.mxu1 %v1588_v1 }
  0xde   :  { %v149_v31 = vpop.f32.mrb[0].mxu0 }
  0xdf   :  { %v1476_v32 = vpop.f32.mrb[1].mxu0  ;;  %v660_v39 = vadd.f32 %v643_v29, %v149_v31 }
  0xe0   :  { %v219_v34 = vpop.f32.mrb[0].mxu1 }
  0xe1   :  { %v661_v35 = vadd.f32 %v645_v30, %v219_v34  ;;  %v1481_v36 = vpop.f32.mrb[1].mxu1 }
  0xe2   :  { %v289_v38 = vpop.f32.mrb[2].mxu0 }
  0xe3   :  { %v676_v40 = vrot.slane %v661_v35, 7  ;;  %v662_v41 = vadd.f32 %v646_v33, %v289_v38  ;;  %v1486_v42 = vpop.f32.mrb[3].mxu0 }
  0xe4   :  { %v359_v44 = vpop.f32.mrb[2].mxu1 }
  0xe5   :  { %v678_v45 = vsel %vm677_vm1, %v676_v40, %v660_v39  ;;  %v679_v46 = vrot.slane %v662_v41, 6  ;;  %v663_v47 = vadd.f32 %v647_v37, %v359_v44  ;;  %v1491_v48 = vpop.f32.mrb[3].mxu1 }
  0xe6   :  { %v429_v50 = vpop.f32.mrb[4].mxu0 }
  0xe7   :  { %v681_v51 = vsel %vm680_vm2, %v679_v46, %v678_v45  ;;  %v682_v52 = vrot.slane %v663_v47, 5  ;;  %v664_v53 = vadd.f32 %v648_v43, %v429_v50  ;;  %v1496_v54 = vpop.f32.mrb[5].mxu0 }
  0xe8   :  { %v499_v56 = vpop.f32.mrb[4].mxu1 }
  0xe9   :  { %v684_v57 = vsel %vm683_vm3, %v682_v52, %v681_v51  ;;  %v685_v58 = vrot.slane %v664_v53, 4  ;;  %v665_v59 = vadd.f32 %v649_v49, %v499_v56  ;;  %v1501_v60 = vpop.f32.mrb[5].mxu1 }
  0xea   :  { %v569_v62 = vpop.f32.mrb[6].mxu0 }
  0xeb   :  { %v687_v63 = vsel %vm686_vm4, %v685_v58, %v684_v57  ;;  %v688_v0 = vrot.slane %v665_v59, 3  ;;  %v666_v2 = vadd.f32 %v650_v55, %v569_v62  ;;  %v1506_v3 = vpop.f32.mrb[7].mxu0 }
  0xec   :  { %v639_v4 = vpop.f32.mrb[6].mxu1 }
  0xed   :  { %v691_v5 = vrot.slane %v666_v2, 2  ;;  %v667_v6 = vadd.f32 %v651_v61, %v639_v4  ;;  %v1511_v7 = vpop.f32.mrb[7].mxu1  ;;  %v690_v8 = vsel %vm689_vm5, %v688_v0, %v687_v63 }
  0xef   :  { %v694_v9 = vrot.slane %v667_v6, 1  ;;  %v693_v10 = vsel %vm692_vm6, %v691_v5, %v690_v8 }
  0xf1   :  { %v696_v11 = vsel %vm695_vm7, %v694_v9, %v693_v10 }
  0xf2   :  { %v699_v12 = vsel %vm698_vm8, %v696_v11, -inf }
  0xf3   :  { %700 = vmax.xlane.f32.xlu0 %v699_v12 }
 0x180   :  { %v701_v14 = vpop.xlane.xlu0 %700 }
 0x181   :  { %v703_v15 = vrot.slane %v701_v14, 1  ;;  %v704_v16 = vrot.slane %v701_v14, 2  ;;  %v705_v17 = vrot.slane %v701_v14, 3  ;;  %v706_v19 = vrot.slane %v701_v14, 4 }
 0x182   :  { %v707_v21 = vrot.slane %v701_v14, 5  ;;  %v708_v23 = vrot.slane %v701_v14, 6  ;;  %v709_v25 = vrot.slane %v701_v14, 7  ;;  %v718_v27 = vsub.f32 %v660_v39, %v701_v14 }
 0x183   :  { %v719_v28 = vsub.f32 %v661_v35, %v703_v15  ;;  %v720_v29 = vsub.f32 %v662_v41, %v704_v16  ;;  %v721_v30 = vsub.f32 %v663_v47, %v705_v17  ;;  %v722_v31 = vsub.f32 %v664_v53, %v706_v19 }
 0x184   :  { %v723_v32 = vsub.f32 %v665_v59, %v707_v21  ;;  %v726_v33 = vmul.f32 1.442695, %v718_v27  ;;  %v724_v34 = vsub.f32 %v666_v2, %v708_v23  ;;  %v725_v40 = vsub.f32 %v667_v6, %v709_v25 }
 0x185   :  { %v728_v36 = vmul.f32 1.442695, %v719_v28  ;;  %v730_v37 = vmul.f32 1.442695, %v720_v29  ;;  %v732_v38 = vmul.f32 1.442695, %v721_v30 }
 0x186   :  { %1556 = vpow2.f32 %v726_v33  ;;  %v734_v42 = vmul.f32 1.442695, %v722_v31  ;;  %v736_v43 = vmul.f32 1.442695, %v723_v32  ;;  %v738_v44 = vmul.f32 1.442695, %v724_v34 }
 0x187   :  { %1558 = vpow2.f32 %v728_v36  ;;  %v740_v45 = vmul.f32 1.442695, %v725_v40 }
 0x188   :  { %1560 = vpow2.f32 %v730_v37 }
 0x189   :  { %1562 = vpow2.f32 %v732_v38 }
 0x18a   :  { %1564 = vpow2.f32 %v734_v42 }
 0x18b   :  { %1566 = vpow2.f32 %v736_v43 }
 0x18c   :  { %1568 = vpow2.f32 %v738_v44 }
 0x18d   :  { %1570 = vpow2.f32 %v740_v45 }
 0x190   :  { %v1557_v35 = vpop.eup %1556 }
 0x191   :  { %v1559_v39 = vpop.eup %1558 }
 0x192   :  { %v1561_v41 = vpop.eup %1560  ;;  %v750_v46 = vrot.slane %v1559_v39, 7 }
 0x193   :  { %v1563_v47 = vpop.eup %1562  ;;  %v752_v48 = vrot.slane %v1561_v41, 6 }
 0x194   :  { %v1565_v49 = vpop.eup %1564  ;;  %v751_v50 = vsel %vm677_vm1, %v750_v46, %v1557_v35  ;;  %v754_v51 = vrot.slane %v1563_v47, 5 }
 0x195   :  { %v1567_v52 = vpop.eup %1566  ;;  %v753_v53 = vsel %vm680_vm2, %v752_v48, %v751_v50  ;;  %v756_v54 = vrot.slane %v1565_v49, 4 }
 0x196   :  { %v1569_v55 = vpop.eup %1568  ;;  %v755_v56 = vsel %vm683_vm3, %v754_v51, %v753_v53  ;;  %v758_v57 = vrot.slane %v1567_v52, 3 }
 0x197   :  { %v1571_v58 = vpop.eup %1570  ;;  %v757_v59 = vsel %vm686_vm4, %v756_v54, %v755_v56  ;;  %v760_v60 = vrot.slane %v1569_v55, 2 }
 0x198   :  { %v759_v61 = vsel %vm689_vm5, %v758_v57, %v757_v59  ;;  %v762_v62 = vrot.slane %v1571_v58, 1 }
 0x199   :  { %v761_v63 = vsel %vm692_vm6, %v760_v60, %v759_v61 }
 0x19a   :  { %v763_v0 = vsel %vm695_vm7, %v762_v62, %v761_v63 }
 0x19b   :  { %v765_v2 = vsel %vm698_vm8, %v763_v0, 0.0 }
 0x19c   :  { %766 = vadd.xlane.f32.xlu0 %v765_v2 }
 0x229   :  { %v767_v3 = vpop.xlane.xlu0 %766 }
 0x22a   :  { %v769_v4 = vrot.slane %v767_v3, 1  ;;  %v770_v5 = vrot.slane %v767_v3, 2  ;;  %v771_v6 = vrot.slane %v767_v3, 3  ;;  %v772_v7 = vrot.slane %v767_v3, 4 }
 0x22b   :  { %1572 = vrcp.f32 %v767_v3  ;;  %v773_v8 = vrot.slane %v767_v3, 5  ;;  %v774_v9 = vrot.slane %v767_v3, 6  ;;  %v775_v10 = vrot.slane %v767_v3, 7 }
 0x22c   :  { %1574 = vrcp.f32 %v769_v4 }
 0x22d   :  { %1576 = vrcp.f32 %v770_v5 }
 0x22e   :  { %1578 = vrcp.f32 %v771_v6 }
 0x22f   :  { %1580 = vrcp.f32 %v772_v7 }
 0x230   :  { %1582 = vrcp.f32 %v773_v8 }
 0x231   :  { %1584 = vrcp.f32 %v774_v9 }
 0x232   :  { %1586 = vrcp.f32 %v775_v10 }
 0x235   :  { %v1573_v11 = vpop.eup %1572 }
 0x236   :  { %v1575_v12 = vpop.eup %1574  ;;  %v785_v14 = vmul.f32 %v1573_v11, %v1557_v35 }
 0x237   :  { %v1577_v15 = vpop.eup %1576  ;;  %v787_v16 = vmul.f32 %v1575_v12, %v1559_v39 }
 0x238   :  { %v1579_v17 = vpop.eup %1578  ;;  %1515 = vmatmul.mubr.msk.f32.vlgmr.msra.gmra.mrb[8].mxu0 %vm698_vm8, %v785_v14  ;;  %v789_v19 = vmul.f32 %v1577_v15, %v1561_v41 }
 0x239   :  { %v1581_v21 = vpop.eup %1580  ;;  %1523 = vmatpush3.msra.mxu0 %v1636_v13  ;;  %1520 = vmatmul.mubr.msk.f32.vlgmr.msra.gmra.mrb[8].mxu1 %vm698_vm8, %v787_v16  ;;  %v1408_v23 = vrot.slane %v787_v16, 7  ;;  %v791_v25 = vmul.f32 %v1579_v17, %v1563_v47 }
 0x23a   :  { %v1583_v27 = vpop.eup %1582  ;;  %1528 = vmatpush3.msra.mxu1 %v1641_v18  ;;  %1524 = vmatprep.mubr.msk.f32.mxu0 %vm1590_vm0, %v1588_v1  ;;  %v1410_v28 = vrot.slane %v789_v19, 6  ;;  %v793_v29 = vmul.f32 %v1581_v21, %v1565_v49 }
 0x23b   :  { %v1585_v30 = vpop.eup %1584  ;;  %v1409_v31 = vsel %vm677_vm1, %v1408_v23, %v785_v14  ;;  %1532 = vmatprep.subr.mxu0 %v1588_v1  ;;  %1529 = vmatprep.mubr.msk.f32.mxu1 %vm1590_vm0, %v1588_v1  ;;  %v1412_v13 = vrot.slane %v791_v25, 5  ;;  %v795_v32 = vmul.f32 %v1583_v27, %v1567_v52 }
 0x23c   :  { %v1587_v33 = vpop.eup %1586  ;;  %1525 = vmatmul.mubr.msk.f32.vlgmr.msra.gmra.mrb[10].mxu0 %vm698_vm8, %v789_v19  ;;  %v1411_v18 = vsel %vm680_vm2, %v1410_v28, %v1409_v31  ;;  %1537 = vmatprep.subr.mxu1 %v1588_v1  ;;  %v1414_v34 = vrot.slane %v793_v29, 4  ;;  %v797_v36 = vmul.f32 %v1585_v30, %v1569_v55 }
 0x23d   :  { %1533 = vmatpush3.msra.mxu0 %v1650_v20  ;;  %1530 = vmatmul.mubr.msk.f32.vlgmr.msra.gmra.mrb[10].mxu1 %vm698_vm8, %v791_v25  ;;  %v1413_v37 = vsel %vm683_vm3, %v1412_v13, %v1411_v18  ;;  %v1416_v38 = vrot.slane %v795_v32, 3  ;;  %v799_v40 = vmul.f32 %v1587_v33, %v1571_v58 }
 0x23e   :  { %1538 = vmatpush3.msra.mxu1 %v1659_v22  ;;  %1534 = vmatprep.mubr.msk.f32.mxu0 %vm1590_vm0, %v1588_v1  ;;  %v1415_v42 = vsel %vm686_vm4, %v1414_v34, %v1413_v37  ;;  %v1418_v43 = vrot.slane %v797_v36, 2 }
 0x23f   :  { %1542 = vmatprep.subr.mxu0 %v1588_v1  ;;  %1539 = vmatprep.mubr.msk.f32.mxu1 %vm1590_vm0, %v1588_v1  ;;  %v1417_v20 = vsel %vm689_vm5, %v1416_v38, %v1415_v42  ;;  %v1420_v44 = vrot.slane %v799_v40, 1 }
 0x240   :  { %1535 = vmatmul.mubr.msk.f32.vlgmr.msra.gmra.mrb[12].mxu0 %vm698_vm8, %v793_v29  ;;  %1547 = vmatprep.subr.mxu1 %v1588_v1  ;;  %v1419_v22 = vsel %vm692_vm6, %v1418_v43, %v1417_v20 }
 0x241   :  { %1543 = vmatpush3.msra.mxu0 %v1668_v24  ;;  %1540 = vmatmul.mubr.msk.f32.vlgmr.msra.gmra.mrb[12].mxu1 %vm698_vm8, %v795_v32  ;;  %v1421_v45 = vsel %vm695_vm7, %v1420_v44, %v1419_v22 }
 0x242   :  { %1548 = vmatpush3.msra.mxu1 %v1677_v26  ;;  %1544 = vmatprep.mubr.msk.f32.mxu0 %vm1590_vm0, %v1588_v1  ;;  %1423 = vst.msk [vmem:[%s1766_s4] sm:$0xff] %vm698_vm8, %v1421_v45 }
 0x243   :  { %1549 = vmatprep.mubr.msk.f32.mxu1 %vm1590_vm0, %v1588_v1 }
 0x244   :  { %1545 = vmatmul.mubr.msk.f32.vlgmr.msra.gmra.mrb[14].mxu0 %vm698_vm8, %v797_v36 }
 0x245   :  { %1550 = vmatmul.mubr.msk.f32.vlgmr.msra.gmra.mrb[14].mxu1 %vm698_vm8, %v799_v40 }
 0x30b   :  { %v869_v24 = vpop.f32.mrb[8].mxu0 }
 0x30c   :  { %v1516_v35 = vpop.f32.mrb[9].mxu0  ;;  %v942_v39 = vpop.f32.mrb[8].mxu1 }
 0x30d   :  { %v1392_v41 = vrot.slane %v942_v39, 7  ;;  %v1521_v26 = vpop.f32.mrb[9].mxu1 }
 0x30f   :  { %v1393_v46 = vsel %vm677_vm1, %v1392_v41, %v869_v24  ;;  %v1015_v47 = vpop.f32.mrb[10].mxu0 }
 0x310   :  { %v1394_v48 = vrot.slane %v1015_v47, 6  ;;  %v1526_v49 = vpop.f32.mrb[11].mxu0  ;;  %v1088_v50 = vpop.f32.mrb[10].mxu1 }
 0x311   :  { %v1396_v51 = vrot.slane %v1088_v50, 5  ;;  %v1531_v52 = vpop.f32.mrb[11].mxu1 }
 0x312   :  { %v1395_v53 = vsel %vm680_vm2, %v1394_v48, %v1393_v46 }
 0x313   :  { %v1397_v1 = vsel %vm683_vm3, %v1396_v51, %v1395_v53  ;;  %v1161_v54 = vpop.f32.mrb[12].mxu0 }
 0x314   :  { %v1398_v55 = vrot.slane %v1161_v54, 4  ;;  %v1536_v56 = vpop.f32.mrb[13].mxu0  ;;  %v1234_v57 = vpop.f32.mrb[12].mxu1 }
 0x315   :  { %v1400_v58 = vrot.slane %v1234_v57, 3  ;;  %v1541_v59 = vpop.f32.mrb[13].mxu1 }
 0x316   :  { %v1399_v60 = vsel %vm686_vm4, %v1398_v55, %v1397_v1 }
 0x317   :  { %v1401_v61 = vsel %vm689_vm5, %v1400_v58, %v1399_v60  ;;  %v1307_v62 = vpop.f32.mrb[14].mxu0 }
 0x318   :  { %v1402_v63 = vrot.slane %v1307_v62, 2  ;;  %v1546_v0 = vpop.f32.mrb[15].mxu0  ;;  %v1380_v2 = vpop.f32.mrb[14].mxu1 }
 0x319   :  { %v1404_v3 = vrot.slane %v1380_v2, 1  ;;  %v1551_v4 = vpop.f32.mrb[15].mxu1 }
 0x31a   :  { %v1403_v5 = vsel %vm692_vm6, %v1402_v63, %v1401_v61 }
 0x31b   :  { %v1405_v6 = vsel %vm695_vm7, %v1404_v3, %v1403_v5 }
 0x31c   :  { %1407 = vst [vmem:[%s1767_s3] sm:$0xff] %v1405_v6 }

</bundles_post_ra>
